<compile_context>
chip_gen: v7x
topology: tpu7x:2x2x1
jax: 0.10.0
libtpu: 0.0.40
codegen_flags: <defaults>
</compile_context>

<pallas_src>
import jax
import jax.numpy as jnp
from jax.experimental import pallas as pl
from jax.experimental.pallas import tpu as pltpu

_NEG_BIG = -1e30  # bias for padded class columns -> exp() underflows to exactly 0


def _round_up(x, m):
    return ((x + m - 1) // m) * m


def mlp_softmax_kernel(x_ref, w1_ref, b1_ref, w2_ref, b2_ref, w3_ref, b3_ref, o_ref):
    # Layer 1: (tb, D) @ (D, Hp) + (1, Hp) -> ReLU   (f32 accumulation on the MXU)
    h1 = jnp.dot(x_ref[...], w1_ref[...], preferred_element_type=jnp.float32)
    h1 = jnp.maximum(h1 + b1_ref[...], 0.0)
    # Layer 2: (tb, Hp) @ (Hp, Hp) + (1, Hp) -> ReLU
    h2 = jnp.dot(h1.astype(w2_ref.dtype), w2_ref[...],
                 preferred_element_type=jnp.float32)
    h2 = jnp.maximum(h2 + b2_ref[...], 0.0)
    # Layer 3: (tb, Hp) @ (Hp, Lp) + (1, Lp); padded class columns carry -1e30 bias.
    logits = jnp.dot(h2.astype(w3_ref.dtype), w3_ref[...],
                     preferred_element_type=jnp.float32) + b3_ref[...]
    # Row softmax over the (padded) class axis; padded columns contribute exp()==0.
    m = jnp.max(logits, axis=-1, keepdims=True)
    e = jnp.exp(logits - m)
    s = jnp.sum(e, axis=-1, keepdims=True)
    o_ref[...] = (e / s).astype(o_ref.dtype)


def nuisance_forward(x, params, l, *, tb=256, compute_dtype=jnp.float32):
    """softmax(ReLU(ReLU(x@W1+b1)@W2+b2)@W3+b3, axis=1). Returns (B, l) float32."""
    w1, b1, w2, b2, w3, b3 = params
    B, D = x.shape
    H = w1.shape[1]  # = 4 * l
    assert w2.shape == (H, H) and w3.shape == (H, l)

    Hp = max(128, _round_up(H, 128))   # lane-dense hidden width
    Lp = max(128, _round_up(l, 128))   # lane-dense class width (lane-dense output)

    # --- pad weights once per call (tiny vs. the matmuls) --------------------
    def pad2(a, shape, fill=0.0):
        out = jnp.full(shape, fill, compute_dtype)
        return out.at[: a.shape[0], : a.shape[1]].set(a.astype(compute_dtype))

    w1p = pad2(w1, (D, Hp))
    b1p = pad2(b1, (1, Hp))
    w2p = pad2(w2, (Hp, Hp))
    b2p = pad2(b2, (1, Hp))
    w3p = pad2(w3, (Hp, Lp))
    b3p = pad2(b3, (1, Lp), fill=_NEG_BIG)  # padded classes -> prob exactly 0

    # --- batch tile: large enough to amortize per-step grid overhead, capped so
    # the double-buffered x tile stays well inside v7x's smaller scoped VMEM. ---
    itemsize = jnp.dtype(compute_dtype).itemsize
    max_tb_vmem = max(8, (8 * 1024 * 1024) // (2 * D * itemsize))
    tb_eff = max(8, (min(tb, max_tb_vmem) // 8) * 8)
    if B < tb_eff:
        tb_eff = _round_up(B, 8)
    Bp = _round_up(B, tb_eff)

    xp = x.astype(compute_dtype)
    if Bp != B:
        xp = jnp.pad(xp, ((0, Bp - B), (0, 0)))

    cost = pl.CostEstimate(
        flops=2 * Bp * (D * Hp + Hp * Hp + Hp * Lp),
        transcendentals=Bp * Lp,
        bytes_accessed=(Bp * D + Bp * Lp) * itemsize
        + (D * Hp + Hp + Hp * Hp + Hp + Hp * Lp + Lp) * itemsize,
    )

    out = pl.pallas_call(
        mlp_softmax_kernel,
        out_shape=jax.ShapeDtypeStruct((Bp, Lp), jnp.float32),
        grid_spec=pltpu.PrefetchScalarGridSpec(
            num_scalar_prefetch=0,
            grid=(Bp // tb_eff,),
            in_specs=[
                pl.BlockSpec((tb_eff, D), lambda i: (i, 0)),  # x tile (streamed)
                pl.BlockSpec((D, Hp), lambda i: (0, 0)),      # w1 (VMEM resident)
                pl.BlockSpec((1, Hp), lambda i: (0, 0)),      # b1
                pl.BlockSpec((Hp, Hp), lambda i: (0, 0)),     # w2
                pl.BlockSpec((1, Hp), lambda i: (0, 0)),      # b2
                pl.BlockSpec((Hp, Lp), lambda i: (0, 0)),     # w3
                pl.BlockSpec((1, Lp), lambda i: (0, 0)),      # b3
            ],
            out_specs=pl.BlockSpec((tb_eff, Lp), lambda i: (i, 0)),  # lane-dense
        ),
        compiler_params=pltpu.CompilerParams(
            dimension_semantics=("parallel",),
        ),
        cost_estimate=cost,
    )(xp, w1p, b1p, w2p, b2p, w3p, b3p)

    return out[:B, :l]


def init_params(input_dim, l, key):
    """nn.Linear-style init (uniform(-1/sqrt(fan_in), +1/sqrt(fan_in))), stored (in, out)."""
    dims = [(input_dim, 4 * l), (4 * l, 4 * l), (4 * l, l)]
    keys = jax.random.split(key, 2 * len(dims))
    params = []
    for i, (fan_in, fan_out) in enumerate(dims):
        bound = 1.0 / (fan_in ** 0.5)
        w = jax.random.uniform(keys[2 * i], (fan_in, fan_out),
                               minval=-bound, maxval=bound, dtype=jnp.float32)
        b = jax.random.uniform(keys[2 * i + 1], (1, fan_out),
                               minval=-bound, maxval=bound, dtype=jnp.float32)
        params += [w, b]
    return tuple(params)


def reference_forward(x, params):
    w1, b1, w2, b2, w3, b3 = params
    h1 = jnp.maximum(x @ w1 + b1, 0.0)
    h2 = jnp.maximum(h1 @ w2 + b2, 0.0)
    return jax.nn.softmax(h2 @ w3 + b3, axis=1)


if __name__ == "__main__":
    key = jax.random.PRNGKey(0)
    kx, kp = jax.random.split(key)

    batch, input_dim, l = 16, 32, 3
    x = jax.random.normal(kx, (batch, input_dim), dtype=jnp.float32)
    params = init_params(input_dim, l, kp)

    out = nuisance_forward(x, params, l)
    out = jax.block_until_ready(out)

    ref = reference_forward(x, params)
    assert out.shape == (batch, l), f"unexpected output shape {out.shape}"
    assert jnp.allclose(out.sum(axis=1), 1.0, atol=1e-5), "softmax rows do not sum to 1"
    assert jnp.allclose(out, ref, atol=1e-5, rtol=1e-5), "mismatch vs reference"

    print("KERNEL_OK")
</pallas_src>

<mosaic_0001>
module attributes {stable_mosaic.version = 11 : i64} {
  func.func @mlp_softmax_kernel(%arg0: i32, %arg1: memref<16x32xf32, #tpu.memory_space<vmem>>, %arg2: memref<32x128xf32, #tpu.memory_space<vmem>>, %arg3: memref<1x128xf32, #tpu.memory_space<vmem>>, %arg4: memref<128x128xf32, #tpu.memory_space<vmem>>, %arg5: memref<1x128xf32, #tpu.memory_space<vmem>>, %arg6: memref<128x128xf32, #tpu.memory_space<vmem>>, %arg7: memref<1x128xf32, #tpu.memory_space<vmem>>, %arg8: memref<16x128xf32, #tpu.memory_space<vmem>>) attributes {dimension_semantics = [#tpu.dimension_semantics<parallel>], iteration_bounds = array<i64: 1>, scalar_prefetch = 0 : i64, scratch_operands = 0 : i64, tpu.core_type = #tpu.core_type<tc>, window_params = [{transform_indices = @transform_0, window_bounds = array<i64: 16, 32>}, {pipeline_mode = #tpu.pipeline_mode<synchronous>, transform_indices = @transform_1, window_bounds = array<i64: 32, 128>}, {pipeline_mode = #tpu.pipeline_mode<synchronous>, transform_indices = @transform_2, window_bounds = array<i64: 1, 128>}, {pipeline_mode = #tpu.pipeline_mode<synchronous>, transform_indices = @transform_3, window_bounds = array<i64: 128, 128>}, {pipeline_mode = #tpu.pipeline_mode<synchronous>, transform_indices = @transform_4, window_bounds = array<i64: 1, 128>}, {pipeline_mode = #tpu.pipeline_mode<synchronous>, transform_indices = @transform_5, window_bounds = array<i64: 128, 128>}, {pipeline_mode = #tpu.pipeline_mode<synchronous>, transform_indices = @transform_6, window_bounds = array<i64: 1, 128>}, {transform_indices = @transform_7, window_bounds = array<i64: 16, 128>}]} {
    %c0 = arith.constant 0 : index
    %c0_0 = arith.constant 0 : index
    %0 = vector.load %arg1[%c0, %c0_0] : memref<16x32xf32, #tpu.memory_space<vmem>>, vector<16x32xf32>
    %c0_1 = arith.constant 0 : index
    %c0_2 = arith.constant 0 : index
    %1 = vector.load %arg2[%c0_1, %c0_2] : memref<32x128xf32, #tpu.memory_space<vmem>>, vector<32x128xf32>
    %cst = arith.constant dense<0.000000e+00> : vector<16x128xf32>
    %2 = tpu.matmul %0, %1, %cst {dimension_numbers = #tpu.dot_dimension_numbers<[1], [0], [0], [1], [0, 0, 1, 1], [], []>} : vector<16x32xf32>, vector<32x128xf32>, vector<16x128xf32> -> vector<16x128xf32>
    %c0_3 = arith.constant 0 : index
    %c0_4 = arith.constant 0 : index
    %3 = vector.load %arg3[%c0_3, %c0_4] : memref<1x128xf32, #tpu.memory_space<vmem>>, vector<1x128xf32>
    %4 = vector.broadcast %3 : vector<1x128xf32> to vector<16x128xf32>
    %5 = arith.addf %2, %4 : vector<16x128xf32>
    %cst_5 = arith.constant 0.000000e+00 : f32
    %6 = vector.broadcast %cst_5 : f32 to vector<16x128xf32>
    %7 = arith.maximumf %5, %6 : vector<16x128xf32>
    %c0_6 = arith.constant 0 : index
    %c0_7 = arith.constant 0 : index
    %8 = vector.load %arg4[%c0_6, %c0_7] : memref<128x128xf32, #tpu.memory_space<vmem>>, vector<128x128xf32>
    %cst_8 = arith.constant dense<0.000000e+00> : vector<16x128xf32>
    %9 = tpu.matmul %7, %8, %cst_8 {dimension_numbers = #tpu.dot_dimension_numbers<[1], [0], [0], [1], [0, 0, 1, 1], [], []>} : vector<16x128xf32>, vector<128x128xf32>, vector<16x128xf32> -> vector<16x128xf32>
    %c0_9 = arith.constant 0 : index
    %c0_10 = arith.constant 0 : index
    %10 = vector.load %arg5[%c0_9, %c0_10] : memref<1x128xf32, #tpu.memory_space<vmem>>, vector<1x128xf32>
    %11 = vector.broadcast %10 : vector<1x128xf32> to vector<16x128xf32>
    %12 = arith.addf %9, %11 : vector<16x128xf32>
    %cst_11 = arith.constant 0.000000e+00 : f32
    %13 = vector.broadcast %cst_11 : f32 to vector<16x128xf32>
    %14 = arith.maximumf %12, %13 : vector<16x128xf32>
    %c0_12 = arith.constant 0 : index
    %c0_13 = arith.constant 0 : index
    %15 = vector.load %arg6[%c0_12, %c0_13] : memref<128x128xf32, #tpu.memory_space<vmem>>, vector<128x128xf32>
    %cst_14 = arith.constant dense<0.000000e+00> : vector<16x128xf32>
    %16 = tpu.matmul %14, %15, %cst_14 {dimension_numbers = #tpu.dot_dimension_numbers<[1], [0], [0], [1], [0, 0, 1, 1], [], []>} : vector<16x128xf32>, vector<128x128xf32>, vector<16x128xf32> -> vector<16x128xf32>
    %c0_15 = arith.constant 0 : index
    %c0_16 = arith.constant 0 : index
    %17 = vector.load %arg7[%c0_15, %c0_16] : memref<1x128xf32, #tpu.memory_space<vmem>>, vector<1x128xf32>
    %18 = vector.broadcast %17 : vector<1x128xf32> to vector<16x128xf32>
    %19 = arith.addf %16, %18 : vector<16x128xf32>
    %cst_17 = arith.constant dense<0xFF800000> : vector<16xf32>
    %20 = vector.multi_reduction <maximumf>, %19, %cst_17 [1] : vector<16x128xf32> to vector<16xf32>
    %21 = vector.shape_cast %20 : vector<16xf32> to vector<16x1xf32>
    %22 = vector.broadcast %21 : vector<16x1xf32> to vector<16x128xf32>
    %23 = arith.subf %19, %22 : vector<16x128xf32>
    %24 = math.exp %23 : vector<16x128xf32>
    %cst_18 = arith.constant dense<0.000000e+00> : vector<16xf32>
    %25 = vector.multi_reduction <add>, %24, %cst_18 [1] : vector<16x128xf32> to vector<16xf32>
    %26 = vector.shape_cast %25 : vector<16xf32> to vector<16x1xf32>
    %27 = vector.broadcast %26 : vector<16x1xf32> to vector<16x128xf32>
    %28 = arith.divf %24, %27 : vector<16x128xf32>
    %c0_19 = arith.constant 0 : index
    %c0_20 = arith.constant 0 : index
    %29 = vector.load %arg8[%c0_19, %c0_20] : memref<16x128xf32, #tpu.memory_space<vmem>>, vector<16x128xf32>
    tpu.vector_store %arg8[%c0_19, %c0_20], %28 {strides = array<i32>} : memref<16x128xf32, #tpu.memory_space<vmem>>, vector<16x128xf32>,
    return
  }
  func.func @transform_0(%arg0: i32) -> (i32, i32) {
    %c0_i32 = arith.constant 0 : i32
    %c0_i32_0 = arith.constant 0 : i32
    return %arg0, %c0_i32 : i32, i32
  }
  func.func @transform_1(%arg0: i32) -> (i32, i32) {
    %c0_i32 = arith.constant 0 : i32
    %c0_i32_0 = arith.constant 0 : i32
    %c0_i32_1 = arith.constant 0 : i32
    return %c0_i32, %c0_i32_0 : i32, i32
  }
  func.func @transform_2(%arg0: i32) -> (i32, i32) {
    %c0_i32 = arith.constant 0 : i32
    %c0_i32_0 = arith.constant 0 : i32
    %c0_i32_1 = arith.constant 0 : i32
    return %c0_i32, %c0_i32_0 : i32, i32
  }
  func.func @transform_3(%arg0: i32) -> (i32, i32) {
    %c0_i32 = arith.constant 0 : i32
    %c0_i32_0 = arith.constant 0 : i32
    %c0_i32_1 = arith.constant 0 : i32
    return %c0_i32, %c0_i32_0 : i32, i32
  }
  func.func @transform_4(%arg0: i32) -> (i32, i32) {
    %c0_i32 = arith.constant 0 : i32
    %c0_i32_0 = arith.constant 0 : i32
    %c0_i32_1 = arith.constant 0 : i32
    return %c0_i32, %c0_i32_0 : i32, i32
  }
  func.func @transform_5(%arg0: i32) -> (i32, i32) {
    %c0_i32 = arith.constant 0 : i32
    %c0_i32_0 = arith.constant 0 : i32
    %c0_i32_1 = arith.constant 0 : i32
    return %c0_i32, %c0_i32_0 : i32, i32
  }
  func.func @transform_6(%arg0: i32) -> (i32, i32) {
    %c0_i32 = arith.constant 0 : i32
    %c0_i32_0 = arith.constant 0 : i32
    %c0_i32_1 = arith.constant 0 : i32
    return %c0_i32, %c0_i32_0 : i32, i32
  }
  func.func @transform_7(%arg0: i32) -> (i32, i32) {
    %c0_i32 = arith.constant 0 : i32
    %c0_i32_0 = arith.constant 0 : i32
    return %arg0, %c0_i32 : i32, i32
  }
}

</mosaic_0001>

<bundles_post_ra>
// kernel: tpu_custom_call.1
= control target key start
LH: loop header
LB: loop body
LE: loop exit
PB: predicated region body
PF: predicated region fallthrough
CT: control target
= control target key end

     0   :  { %12 = vsyncpa [#allocation3], 0  ;;  %s896_s0 = inlined_call_operand.hbm [shape: f32[16,32], index: 0, kind: input, shape index: {}]   ;;  %s897_s1 = inlined_call_operand.hbm [shape: f32[32,128], index: 1, kind: input, shape index: {}]   ;;  %s898_s2 = inlined_call_operand.vmem [shape: f32[1,128], index: 2, kind: input, shape index: {}]   ;;  %s899_s3 = inlined_call_operand.hbm [shape: f32[128,128], index: 3, kind: input, shape index: {}]   ;;  %s900_s4 = inlined_call_operand.vmem [shape: f32[1,128], index: 4, kind: input, shape index: {}]   ;;  %s901_s5 = inlined_call_operand.hbm [shape: f32[128,128], index: 5, kind: input, shape index: {}]   ;;  %s902_s6 = inlined_call_operand.vmem [shape: f32[1,128], index: 6, kind: input, shape index: {}]   ;;  %s903_s7 = inlined_call_operand.hbm [shape: f32[16,128], index: 7, kind: output, shape index: {}]  }
   0x1   :  { %13 = vsyncpa [#allocation6], 0 }
   0x2   :  { %14 = vsyncpa [#allocation9], 0 }
   0x3   :  { %15 = vsyncpa [#allocation4], 0  ;;  %s749_s24 = smov [#allocation5]   ;;  %s750_s26 = smov [#allocation2]  }
   0x4   :  { %s33_s25 = sshll.u32 %s749_s24, 4  ;;  %s21_s27 = sshll.u32 %s750_s26, 4  ;;  %s34_s25 = int_to_ptr.vmem [resolvable:$true] %s33_s25  ;;  %s796_s27 = int_to_ptr.vmem [resolvable:$true] %s21_s27 }
   0x5   :  { %s631_s30 = scalar_lea.hbm %s897_s1, 512 }
   0x6   :  { %p632_p0 = scmp.ne.s32.totalorder %s897_s1, %s631_s30  ;;  %p635_p1 = scmp.lt.u32.totalorder %s631_s30, %s897_s1 }
   0x8   :  { %p637_p2 = pnand %p635_p1, %p632_p0 }
   0xa   :  { %640 = shalt.err (!%p637_p2)
}
   0xb   :  { %s641_s12 = scalar_lea.vmem %s34_s25, 512  ;;  %p646_p4 = scmp.lt.s32.totalorder %s34_s25, %s34_s25 }
   0xc   :  { %p642_p3 = scmp.ne.s32.totalorder %s34_s25, %s641_s12  ;;  %p647_p5 = scmp.lt.s32.totalorder %s641_s12, %s641_s12 }
   0xe   :  { %p648_p6 = por %p647_p5, %p646_p4 }
  0x10   :  { %p649_p7 = pnand %p648_p6, %p642_p3 }
  0x12   :  { %652 = shalt.err (!%p649_p7)
}
  0x13   :  { %s751_s13 = smov 128   ;;  %s752_s14 = smov 8  }
  0x14   :  { %39 = dma.hbm_to_vmem [thread:$0]  %s897_s1, 512, %s34_s25, [#allocation6], %s751_s13, %s751_s13, %s752_s14  }
  0x15   :  { %s653_s19 = scalar_lea.hbm %s896_s0, 256 }
  0x16   :  { %p654_p8 = scmp.ne.s32.totalorder %s896_s0, %s653_s19  ;;  %p657_p9 = scmp.lt.u32.totalorder %s653_s19, %s896_s0 }
  0x18   :  { %p659_p10 = pnand %p657_p9, %p654_p8 }
  0x1a   :  { %662 = shalt.err (!%p659_p10)
}
  0x1b   :  { %s663_s24 = scalar_lea.vmem %s796_s27, 256  ;;  %p668_p12 = scmp.lt.s32.totalorder %s796_s27, %s796_s27 }
  0x1c   :  { %p664_p11 = scmp.ne.s32.totalorder %s796_s27, %s663_s24  ;;  %p669_p13 = scmp.lt.s32.totalorder %s663_s24, %s663_s24 }
  0x1e   :  { %p670_p0 = por %p669_p13, %p668_p12 }
  0x20   :  { %p671_p1 = pnand %p670_p0, %p664_p11 }
  0x22   :  { %674 = shalt.err (!%p671_p1)
}
  0x23   :  { %27 = dma.hbm_to_vmem [thread:$0]  %s896_s0, 256, %s796_s27, [#allocation3], %s751_s13, %s751_s13, %s752_s14  }
  0x24   :  { %s753_s26 = smov [#allocation7]   ;;  %s754_s29 = smov [#allocation8]  }
  0x25   :  { %s47_s28 = sshll.u32 %s753_s26, 4  ;;  %s61_s30 = sshll.u32 %s754_s29, 4  ;;  %s48_s28 = int_to_ptr.vmem [resolvable:$true] %s47_s28  ;;  %s833_s30 = int_to_ptr.vmem [resolvable:$true] %s61_s30 }
  0x26   :  { %s675_s10 = scalar_lea.hbm %s899_s3, 2048 }
  0x27   :  { %p676_p2 = scmp.ne.s32.totalorder %s899_s3, %s675_s10  ;;  %p679_p3 = scmp.lt.u32.totalorder %s675_s10, %s899_s3 }
  0x29   :  { %p681_p4 = pnand %p679_p3, %p676_p2 }
  0x2b   :  { %684 = shalt.err (!%p681_p4)
}
  0x2c   :  { %s685_s0 = scalar_lea.vmem %s48_s28, 2048  ;;  %p690_p6 = scmp.lt.s32.totalorder %s48_s28, %s48_s28 }
  0x2d   :  { %p686_p5 = scmp.ne.s32.totalorder %s48_s28, %s685_s0  ;;  %p691_p7 = scmp.lt.s32.totalorder %s685_s0, %s685_s0 }
  0x2f   :  { %p692_p8 = por %p691_p7, %p690_p6 }
  0x31   :  { %p693_p9 = pnand %p692_p8, %p686_p5 }
  0x33   :  { %696 = shalt.err (!%p693_p9)
}
  0x34   :  { %53 = dma.hbm_to_vmem [thread:$0]  %s899_s3, 2048, %s48_s28, [#allocation6], %s751_s13, %s751_s13, %s752_s14  }
  0x35   :  { %s697_s20 = scalar_lea.hbm %s901_s5, 2048 }
  0x36   :  { %p698_p10 = scmp.ne.s32.totalorder %s901_s5, %s697_s20  ;;  %p701_p11 = scmp.lt.u32.totalorder %s697_s20, %s901_s5 }
  0x38   :  { %p703_p12 = pnand %p701_p11, %p698_p10 }
  0x3a   :  { %706 = shalt.err (!%p703_p12)
}
  0x3b   :  { %s707_s1 = scalar_lea.vmem %s833_s30, 2048  ;;  %p712_p0 = scmp.lt.s32.totalorder %s833_s30, %s833_s30 }
  0x3c   :  { %p708_p13 = scmp.ne.s32.totalorder %s833_s30, %s707_s1  ;;  %p713_p1 = scmp.lt.s32.totalorder %s707_s1, %s707_s1 }
  0x3e   :  { %p714_p2 = por %p713_p1, %p712_p0 }
  0x40   :  { %p715_p3 = pnand %p714_p2, %p708_p13 }
  0x42   :  { %718 = shalt.err (!%p715_p3)
}
  0x43   :  { %67 = dma.hbm_to_vmem [thread:$0]  %s901_s5, 2048, %s833_s30, [#allocation9], %s751_s13, %s751_s13, %s752_s14  }
  0x44   :  { %741 = dma.done.wait [#allocation3], 256  }
  0x45   :  { %742 = vsyncadd [#allocation3], 4294967040 }
  0x46   :  { %743 = dma.done.wait [#allocation6], 2560  }
  0x47   :  { %744 = vsyncadd [#allocation6], 4294964736 }
  0x48   :  { %745 = dma.done.wait [#allocation9], 2048  }
  0x49   :  { %746 = vsyncadd [#allocation9], 4294965248  ;;  %vm95_vm0 = vcmask 261120   ;;  %v84_v0 = vld [vmem:[#allocation5] sm:$0xff]  ;;  %v85_v1 = vld [vmem:[#allocation5 + $0x8] sm:$0xff] }
  0x4a   :  { %v86_v2 = vld [vmem:[#allocation5 + $0x10] sm:$0xff]  ;;  %v544_v3 = vpack.c.bf16 %v85_v1, %v84_v0  ;;  %v87_v4 = vld [vmem:[#allocation5 + $0x18] sm:$0xff]  ;;  %v179_v7 = vld [vmem:[#allocation7] sm:$0xff] }
  0x4b   :  { %v82_v5 = vld [vmem:[#allocation2] sm:$0xff]  ;;  %v548_v6 = vpack.c.bf16 %v87_v4, %v86_v2  ;;  %v180_v8 = vld [vmem:[#allocation7 + $0x8] sm:$0xff]  ;;  %v182_v11 = vld [vmem:[#allocation7 + $0x18] sm:$0xff] }
  0x4c   :  { %471 = vmatprep.mubr.msk.f32.mxu0 %vm95_vm0, %v82_v5  ;;  %v181_v9 = vld [vmem:[#allocation7 + $0x10] sm:$0xff]  ;;  %545 = vmatprep.subr.bf16.mxu0 %v544_v3  ;;  %v552_v10 = vpack.c.bf16 %v180_v8, %v179_v7  ;;  %v183_v13 = vld [vmem:[#allocation7 + $0x20] sm:$0xff]  ;;  %v184_v14 = vld [vmem:[#allocation7 + $0x28] sm:$0xff] }
  0x4d   :  { %547 = vmatpush3.bf16.msra.mxu0 %v544_v3  ;;  %v556_v12 = vpack.c.bf16 %v182_v11, %v181_v9  ;;  %v560_v15 = vpack.c.bf16 %v184_v14, %v183_v13  ;;  %v83_v16 = vld [vmem:[#allocation2 + $0x8] sm:$0xff]  ;;  %v185_v17 = vld [vmem:[#allocation7 + $0x30] sm:$0xff]  ;;  %v187_v20 = vld [vmem:[#allocation7 + $0x40] sm:$0xff] }
  0x4e   :  { %549 = vmatprep.subr.bf16.mxu0 %v548_v6  ;;  %553 = vmatprep.subr.bf16.mxu1 %v552_v10  ;;  %v186_v18 = vld [vmem:[#allocation7 + $0x38] sm:$0xff]  ;;  %v188_v21 = vld [vmem:[#allocation7 + $0x48] sm:$0xff]  ;;  %v189_v23 = vld [vmem:[#allocation7 + $0x50] sm:$0xff] }
  0x4f   :  { %555 = vmatpush3.bf16.msra.mxu1 %v552_v10  ;;  %v564_v19 = vpack.c.bf16 %v186_v18, %v185_v17  ;;  %v568_v22 = vpack.c.bf16 %v188_v21, %v187_v20  ;;  %v190_v24 = vld [vmem:[#allocation7 + $0x58] sm:$0xff]  ;;  %v191_v26 = vld [vmem:[#allocation7 + $0x60] sm:$0xff]  ;;  %v192_v27 = vld [vmem:[#allocation7 + $0x68] sm:$0xff] }
  0x50   :  { %557 = vmatprep.subr.bf16.mxu1 %v556_v12  ;;  %v572_v25 = vpack.c.bf16 %v190_v24, %v189_v23  ;;  %v576_v28 = vpack.c.bf16 %v192_v27, %v191_v26  ;;  %v193_v29 = vld [vmem:[#allocation7 + $0x70] sm:$0xff]  ;;  %v194_v30 = vld [vmem:[#allocation7 + $0x78] sm:$0xff]  ;;  %v279_v32 = vld [vmem:[#allocation8] sm:$0xff] }
  0x51   :  { %551 = vmatpush3.bf16.msra.mxu0 %v548_v6  ;;  %v580_v31 = vpack.c.bf16 %v194_v30, %v193_v29  ;;  %v280_v33 = vld [vmem:[#allocation8 + $0x8] sm:$0xff]  ;;  %v281_v34 = vld [vmem:[#allocation8 + $0x10] sm:$0xff]  ;;  %v282_v36 = vld [vmem:[#allocation8 + $0x18] sm:$0xff] }
  0x52   :  { %v584_v35 = vpack.c.bf16 %v280_v33, %v279_v32  ;;  %v588_v37 = vpack.c.bf16 %v282_v36, %v281_v34  ;;  %v283_v38 = vld [vmem:[#allocation8 + $0x20] sm:$0xff]  ;;  %v284_v39 = vld [vmem:[#allocation8 + $0x28] sm:$0xff]  ;;  %v285_v41 = vld [vmem:[#allocation8 + $0x30] sm:$0xff] }
  0x53   :  { %559 = vmatpush3.bf16.msra.mxu1 %v556_v12  ;;  %v592_v40 = vpack.c.bf16 %v284_v39, %v283_v38  ;;  %v286_v42 = vld [vmem:[#allocation8 + $0x38] sm:$0xff]  ;;  %v287_v44 = vld [vmem:[#allocation8 + $0x40] sm:$0xff]  ;;  %v288_v45 = vld [vmem:[#allocation8 + $0x48] sm:$0xff] }
  0x54   :  { %472 = vmatmul.mubr.msk.f32.vlgmr.msra.gmra.mrb[0].mxu0 %vm95_vm0, %v83_v16  ;;  %561 = vmatprep.subr.bf16.mxu1 %v560_v15  ;;  %v596_v43 = vpack.c.bf16 %v286_v42, %v285_v41  ;;  %v600_v46 = vpack.c.bf16 %v288_v45, %v287_v44  ;;  %v289_v47 = vld [vmem:[#allocation8 + $0x50] sm:$0xff]  ;;  %v290_v48 = vld [vmem:[#allocation8 + $0x58] sm:$0xff]  ;;  %v291_v50 = vld [vmem:[#allocation8 + $0x60] sm:$0xff] }
  0x55   :  { %585 = vmatprep.subr.bf16.mxu0 %v584_v35  ;;  %v604_v49 = vpack.c.bf16 %v290_v48, %v289_v47  ;;  %v292_v51 = vld [vmem:[#allocation8 + $0x68] sm:$0xff]  ;;  %v416_v53 = vld [vmem:[%s898_s2] ss:$0 sm:$0xff]  ;;  %v294_v61 = vld [vmem:[#allocation8 + $0x78] sm:$0xff] }
  0x56   :  { %587 = vmatpush3.bf16.msra.mxu0 %v584_v35  ;;  %v608_v52 = vpack.c.bf16 %v292_v51, %v291_v50  ;;  %v293_v60 = vld [vmem:[#allocation8 + $0x70] sm:$0xff] }
  0x57   :  { %563 = vmatpush3.bf16.msra.mxu1 %v560_v15  ;;  %589 = vmatprep.subr.bf16.mxu0 %v588_v37  ;;  %v612_v62 = vpack.c.bf16 %v294_v61, %v293_v60  ;;  %v419_v63 = vld [vmem:[%s900_s4] ss:$0 sm:$0xff]  ;;  %s755_s4 = smov [#allocation10]  }
  0x58   :  { %565 = vmatprep.subr.bf16.mxu1 %v564_v19  ;;  %v420_v6 = vld [vmem:[%s902_s6] ss:$0 sm:$0xff]  ;;  %s402_s6 = sshll.u32 %s755_s4, 4  ;;  %s403_s6 = int_to_ptr.vmem [resolvable:$true] %s402_s6 }
  0x59   :  { %s719_s8 = scalar_lea.vmem %s403_s6, 256  ;;  %p724_p5 = scmp.lt.s32.totalorder %s403_s6, %s403_s6 }
  0x5a   :  { %591 = vmatpush3.bf16.msra.mxu0 %v588_v37  ;;  %p720_p4 = scmp.ne.s32.totalorder %s403_s6, %s719_s8  ;;  %p725_p6 = scmp.lt.s32.totalorder %s719_s8, %s719_s8 }
  0x5b   :  { %567 = vmatpush3.bf16.msra.mxu1 %v564_v19  ;;  %593 = vmatprep.subr.bf16.mxu0 %v592_v40 }
  0x5c   :  { %569 = vmatprep.subr.bf16.mxu1 %v568_v22  ;;  %p726_p7 = por %p725_p6, %p724_p5 }
  0x5e   :  { %595 = vmatpush3.bf16.msra.mxu0 %v592_v40  ;;  %p727_p8 = pnand %p726_p7, %p720_p4 }
  0x5f   :  { %571 = vmatpush3.bf16.msra.mxu1 %v568_v22  ;;  %597 = vmatprep.subr.bf16.mxu0 %v596_v43 }
  0x60   :  { %573 = vmatprep.subr.bf16.mxu1 %v572_v25 }
  0x62   :  { %599 = vmatpush3.bf16.msra.mxu0 %v596_v43 }
  0x63   :  { %575 = vmatpush3.bf16.msra.mxu1 %v572_v25  ;;  %601 = vmatprep.subr.bf16.mxu0 %v600_v46 }
  0x64   :  { %577 = vmatprep.subr.bf16.mxu1 %v576_v28 }
  0x66   :  { %603 = vmatpush3.bf16.msra.mxu0 %v600_v46 }
  0x67   :  { %579 = vmatpush3.bf16.msra.mxu1 %v576_v28  ;;  %605 = vmatprep.subr.bf16.mxu0 %v604_v49 }
  0x68   :  { %581 = vmatprep.subr.bf16.mxu1 %v580_v31 }
  0x6a   :  { %607 = vmatpush3.bf16.msra.mxu0 %v604_v49 }
  0x6b   :  { %583 = vmatpush3.bf16.msra.mxu1 %v580_v31  ;;  %609 = vmatprep.subr.bf16.mxu0 %v608_v52 }
  0x6e   :  { %611 = vmatpush3.bf16.msra.mxu0 %v608_v52 }
  0x6f   :  { %613 = vmatprep.subr.bf16.mxu0 %v612_v62 }
  0x72   :  { %615 = vmatpush3.bf16.msra.mxu0 %v612_v62 }
 0x127   :  { %v473_v54 = vpop.f32.mrb[0].mxu0 }
 0x128   :  { %v174_v55 = vadd.f32 %v473_v54, %v416_v53  ;;  %v168_v56 = vpop.f32.mrb[1].mxu0 }
 0x129   :  { %v169_v57 = vadd.f32 %v416_v53, %v168_v56 }
 0x12a   :  { %v178_v59 = vmax.f32 %v174_v55, 0.0 }
 0x12b   :  { %v177_v58 = vmax.f32 %v169_v57, 0.0 }
 0x12d   :  { %506 = vmatprep.mubr.f32.mxu1 %v177_v58 }
 0x12e   :  { %507 = vmatmul.mubr.f32.vlgmr.msra.gmra.mrb[0].mxu1 %v178_v59 }
 0x201   :  { %v508_v0 = vpop.f32.mrb[0].mxu1 }
 0x202   :  { %v274_v1 = vadd.f32 %v508_v0, %v419_v63  ;;  %v268_v2 = vpop.f32.mrb[1].mxu1 }
 0x203   :  { %v269_v3 = vadd.f32 %v419_v63, %v268_v2 }
 0x204   :  { %v278_v5 = vmax.f32 %v274_v1, 0.0 }
 0x205   :  { %v277_v4 = vmax.f32 %v269_v3, 0.0 }
 0x207   :  { %541 = vmatprep.mubr.f32.mxu0 %v277_v4 }
 0x208   :  { %542 = vmatmul.mubr.f32.vlgmr.msra.gmra.mrb[2].mxu0 %v278_v5 }
 0x2db   :  { %v543_v7 = vpop.f32.mrb[2].mxu0 }
 0x2dc   :  { %v368_v8 = vpop.f32.mrb[3].mxu0  ;;  %v374_v10 = vadd.f32 %v543_v7, %v420_v6 }
 0x2dd   :  { %v369_v9 = vadd.f32 %v420_v6, %v368_v8 }
 0x2df   :  { %377 = vmax.xlane.f32.xlu0 %v369_v9 }
 0x2e3   :  { %379 = vmax.xlane.f32.xlu0 %v374_v10 }
 0x36c   :  { %v378_v11 = vpop.xlane.xlu0 %377 }
 0x36d   :  { %v381_v12 = vsub.f32 %v369_v9, %v378_v11 }
 0x36f   :  { %v383_v13 = vmul.f32 1.442695, %v381_v12 }
 0x370   :  { %v380_v14 = vpop.xlane.xlu0 %379 }
 0x371   :  { %623 = vpow2.f32 %v383_v13  ;;  %v382_v15 = vsub.f32 %v374_v10, %v380_v14 }
 0x373   :  { %v385_v16 = vmul.f32 1.442695, %v382_v15 }
 0x375   :  { %625 = vpow2.f32 %v385_v16 }
 0x37b   :  { %v624_v17 = vpop.eup %623 }
 0x37c   :  { %387 = vadd.xlane.f32.xlu1 %v624_v17 }
 0x37f   :  { %v626_v18 = vpop.eup %625 }
 0x380   :  { %389 = vadd.xlane.f32.xlu1 %v626_v18 }
 0x409   :  { %v388_v19 = vpop.xlane.xlu1 %387 }
 0x40a   :  { %627 = vrcp.f32 %v388_v19 }
 0x40d   :  { %v390_v20 = vpop.xlane.xlu1 %389 }
 0x40e   :  { %629 = vrcp.f32 %v390_v20 }
 0x414   :  { %v628_v21 = vpop.eup %627 }
 0x415   :  { %v392_v22 = vmul.f32 %v628_v21, %v624_v17 }
 0x417   :  { %395 = vst [vmem:[#allocation10] sm:$0xff] %v392_v22 }
 0x418   :  { %v630_v23 = vpop.eup %629 }
 0x419   :  { %v394_v24 = vmul.f32 %v630_v23, %v626_v18 }
 0x41b   :  { %396 = vst [vmem:[#allocation10 + $0x8] sm:$0xff] %v394_v24 }
 0x41c   :  { %730 = shalt.err (!%p727_p8)
}
 0x41d   :  { %s731_s11 = scalar_lea.hbm %s903_s7, 256 }
 0x41e   :  { %p732_p9 = scmp.ne.s32.totalorder %s903_s7, %s731_s11  ;;  %p735_p10 = scmp.lt.u32.totalorder %s731_s11, %s903_s7 }
 0x420   :  { %p737_p11 = pnand %p735_p10, %p732_p9 }
 0x422   :  { %740 = shalt.err (!%p737_p11)
}
 0x423   :  { %408 = dma.vmem_to_hbm [thread:$0]  %s403_s6, 256, %s903_s7, [#allocation4], %s751_s13, %s751_s13, %s752_s14  }
 0x424   :  { %747 = dma.done.wait [#allocation4], 256  }
 0x425   :  { %748 = vsyncadd [#allocation4], 4294967040 }
 0x426   :  { %412 = vsyncpa [#allocation3], 1 }
 0x427   :  { %413 = vsyncpa [#allocation6], 1 }
 0x428   :  { %414 = vsyncpa [#allocation9], 1 }
 0x429   :  { %415 = vsyncpa [#allocation4], 1 }

</bundles_post_ra>
